<compile_context>
chip_gen: v7x
topology: tpu7x:2x2x1
jax: 0.10.0
libtpu: 0.0.40
codegen_flags: <defaults>
</compile_context>

<pallas_src>
import jax
import jax.numpy as jnp
from jax.experimental import pallas as pl
from jax.experimental.pallas import tpu as pltpu


def _round_up(v, m):
    return ((v + m - 1) // m) * m


def _row_tiling(n_rows, target=256):
    """Rows-per-block (multiple of 8) and padded row count; prefer >=2 grid steps."""
    n8 = _round_up(n_rows, 8)
    rt = min(target, n8)
    if n8 // rt < 2 and n8 >= 16:        # give both TensorCores work when possible
        rt = _round_up(n8 // 2, 8)
    return rt, _round_up(n_rows, rt)


def _avg_matrix(seq_len, kernel_size, dtype=jnp.float32):
    """(L, L) matrix A with (x_row @ A)[t] == edge-replicated moving average at t."""
    pad = (kernel_size - 1) // 2
    t = jnp.arange(seq_len)                                     # output position
    off = jnp.arange(-pad, pad + 1)                             # window offsets
    src = jnp.clip(t[None, :] + off[:, None], 0, seq_len - 1)   # (k, L) source index
    j = jnp.arange(seq_len)
    counts = (src[None, :, :] == j[:, None, None]).astype(dtype).sum(axis=1)  # (L, L)
    return counts / kernel_size


def _combine_shared(avg, w_s, b_s, w_t, b_t):
    """Fold decomposition + both heads into one (L, P) weight and (P,) bias."""
    hi = jax.lax.Precision.HIGHEST
    ws_t = jnp.transpose(w_s).astype(jnp.float32)               # (L, P)
    wt_t = jnp.transpose(w_t).astype(jnp.float32)
    wc = ws_t + jnp.matmul(avg, wt_t - ws_t, precision=hi)
    bias = (b_s + b_t).astype(jnp.float32)
    return wc, bias


def _combine_individual(avg, w_s, b_s, w_t, b_t):
    """Per-channel fold: (C, L, P) weight and (C, P) bias."""
    hi = jax.lax.Precision.HIGHEST
    ws_t = jnp.transpose(w_s, (0, 2, 1)).astype(jnp.float32)    # (C, L, P)
    wt_t = jnp.transpose(w_t, (0, 2, 1)).astype(jnp.float32)
    wc = ws_t + jnp.einsum("jt,ctp->cjp", avg, wt_t - ws_t, precision=hi)
    bias = (b_s + b_t).astype(jnp.float32)                      # (C, P)
    return wc, bias


def _dlinear_matmul_kernel(x_ref, w_ref, b_ref, out_ref):
    # x_ref  : (Rt, L)  rows = flattened (batch[, channel]), lanes = seq
    # w_ref  : (L, P)   combined weight  Ws^T + A @ (Wt^T - Ws^T)
    # b_ref  : (1, P)   summed bias
    # out_ref: (Rt, P)
    acc = jnp.dot(x_ref[...].astype(w_ref.dtype), w_ref[...],
                  preferred_element_type=jnp.float32)            # MXU
    out_ref[...] = (acc + b_ref[...]).astype(out_ref.dtype)


def _run_shared(xr, wc, bias, out_dtype):
    """xr: (rows, L), wc: (L, P), bias: (P,) -> (rows, P)."""
    rows, L = xr.shape
    P = wc.shape[-1]
    rt, rows_pad = _row_tiling(rows)
    if rows_pad != rows:
        xr = jnp.pad(xr, ((0, rows_pad - rows), (0, 0)))
    out = pl.pallas_call(
        _dlinear_matmul_kernel,
        out_shape=jax.ShapeDtypeStruct((rows_pad, P), out_dtype),
        grid_spec=pltpu.PrefetchScalarGridSpec(
            num_scalar_prefetch=0,
            grid=(rows_pad // rt,),
            in_specs=[
                pl.BlockSpec((rt, L), lambda i: (i, 0)),     # only read of x
                pl.BlockSpec((L, P), lambda i: (0, 0)),      # resident weight
                pl.BlockSpec((1, P), lambda i: (0, 0)),      # resident bias
            ],
            out_specs=pl.BlockSpec((rt, P), lambda i: (i, 0)),
        ),
        compiler_params=pltpu.CompilerParams(
            dimension_semantics=("parallel",),
            vmem_limit_bytes=32 * 1024 * 1024,               # safe on v5e/v6e/v7x
        ),
    )(xr, wc, bias.reshape(1, P))
    return out[:rows]


def _run_individual(xc, wc, bias, out_dtype):
    """xc: (C, B, L), wc: (C, L, P), bias: (C, P) -> (C, B, P)."""
    C, B, L = xc.shape
    P = wc.shape[-1]
    bt, b_pad = _row_tiling(B)
    if b_pad != B:
        xc = jnp.pad(xc, ((0, 0), (0, b_pad - B), (0, 0)))
    out = pl.pallas_call(
        _dlinear_matmul_kernel,
        out_shape=jax.ShapeDtypeStruct((C, b_pad, P), out_dtype),
        grid_spec=pltpu.PrefetchScalarGridSpec(
            num_scalar_prefetch=0,
            grid=(C, b_pad // bt),
            in_specs=[
                pl.BlockSpec((None, bt, L), lambda c, i: (c, i, 0)),
                pl.BlockSpec((None, L, P), lambda c, i: (c, 0, 0)),
                pl.BlockSpec((None, 1, P), lambda c, i: (c, 0, 0)),
            ],
            out_specs=pl.BlockSpec((None, bt, P), lambda c, i: (c, i, 0)),
        ),
        compiler_params=pltpu.CompilerParams(
            dimension_semantics=("parallel", "parallel"),
            vmem_limit_bytes=32 * 1024 * 1024,
        ),
    )(xc, wc, bias.reshape(C, 1, P))
    return out[:, :B]


def dlinear_forward(x, w_seasonal, b_seasonal, w_trend, b_trend,
                    *, kernel_size=25, individual=False, n_targs=1):
    """DLinear forward.

    x : (B, L, C)   [Batch, Input length, Channel]
    individual=False : w_* shape (P, L), b_* shape (P,)
    individual=True  : w_* shape (C, P, L), b_* shape (C, P)
    returns (B, P) if n_targs == 1 else (B, P, C)
    """
    assert kernel_size % 2 == 1, "kernel_size must be odd (PyTorch module uses 25)"
    B, L, C = x.shape
    avg = _avg_matrix(L, kernel_size, jnp.float32)

    if n_targs == 1:
        # Channels never mix: only the last channel contributes to out[:, :, -1].
        x_last = x[:, :, C - 1]                                  # (B, L)
        if individual:
            wc, bias = _combine_shared(avg, w_seasonal[C - 1], b_seasonal[C - 1],
                                       w_trend[C - 1], b_trend[C - 1])
        else:
            wc, bias = _combine_shared(avg, w_seasonal, b_seasonal, w_trend, b_trend)
        return _run_shared(x_last, wc, bias, x.dtype)            # (B, P)

    if individual:
        wc, bias = _combine_individual(avg, w_seasonal, b_seasonal, w_trend, b_trend)
        xc = jnp.transpose(x, (2, 0, 1))                         # (C, B, L)
        out = _run_individual(xc, wc, bias, x.dtype)             # (C, B, P)
        return jnp.transpose(out, (1, 2, 0))                     # (B, P, C)

    wc, bias = _combine_shared(avg, w_seasonal, b_seasonal, w_trend, b_trend)
    xr = jnp.transpose(x, (0, 2, 1)).reshape(B * C, L)           # lane-dense rows
    out = _run_shared(xr, wc, bias, x.dtype)                     # (B*C, P)
    out = out.reshape(B, C, -1)
    return jnp.transpose(out, (0, 2, 1))                         # (B, P, C)


def _reference_dlinear(x, w_s, b_s, w_t, b_t, kernel_size, n_targs, individual=False):
    """Pure-JAX replica of the PyTorch DLinear.forward."""
    B, L, C = x.shape
    pad = (kernel_size - 1) // 2
    front = jnp.broadcast_to(x[:, 0:1, :], (B, pad, C))
    end = jnp.broadcast_to(x[:, L - 1:L, :], (B, pad, C))
    xp = jnp.concatenate([front, x, end], axis=1)
    windows = jnp.stack([xp[:, j:j + L, :] for j in range(kernel_size)], axis=0)
    mean = jnp.mean(windows, axis=0)
    res = x - mean
    hi = jax.lax.Precision.HIGHEST
    if individual:
        seasonal = jnp.einsum("blc,cpl->bcp", res, w_s, precision=hi) + b_s[None]
        trend = jnp.einsum("blc,cpl->bcp", mean, w_t, precision=hi) + b_t[None]
    else:
        seasonal = jnp.einsum("blc,pl->bcp", res, w_s, precision=hi) + b_s
        trend = jnp.einsum("blc,pl->bcp", mean, w_t, precision=hi) + b_t
    out = jnp.transpose(seasonal + trend, (0, 2, 1))             # (B, P, C)
    return out[:, :, -1] if n_targs == 1 else out


if __name__ == "__main__":
    key = jax.random.PRNGKey(0)
    B, L, C, P = 2, 128, 8, 64      # batch, forecast_history, enc_in, forecast_length
    kernel_size = 25                # DLinear default
    ks = jax.random.split(key, 9)

    x = jax.random.normal(ks[0], (B, L, C), dtype=jnp.float32)
    lim = 1.0 / (L ** 0.5)
    # shared (individual=False) heads: nn.Linear(L, P)
    w_s = jax.random.uniform(ks[1], (P, L), jnp.float32, -lim, lim)
    b_s = jax.random.uniform(ks[2], (P,), jnp.float32, -lim, lim)
    w_t = jax.random.uniform(ks[3], (P, L), jnp.float32, -lim, lim)
    b_t = jax.random.uniform(ks[4], (P,), jnp.float32, -lim, lim)
    # per-channel (individual=True) heads
    w_si = jax.random.uniform(ks[5], (C, P, L), jnp.float32, -lim, lim)
    b_si = jax.random.uniform(ks[6], (C, P), jnp.float32, -lim, lim)
    w_ti = jax.random.uniform(ks[7], (C, P, L), jnp.float32, -lim, lim)
    b_ti = jax.random.uniform(ks[8], (C, P), jnp.float32, -lim, lim)

    # shared, n_targs == 1 (module default): (B, P)
    out = dlinear_forward(x, w_s, b_s, w_t, b_t, kernel_size=kernel_size, n_targs=1)
    jax.block_until_ready(out)
    ref = _reference_dlinear(x, w_s, b_s, w_t, b_t, kernel_size, 1)
    assert out.shape == ref.shape == (B, P)
    assert jnp.allclose(out, ref, atol=2e-3, rtol=2e-3), float(jnp.max(jnp.abs(out - ref)))

    # shared, multi-target: (B, P, C)
    out_full = dlinear_forward(x, w_s, b_s, w_t, b_t, kernel_size=kernel_size, n_targs=C)
    jax.block_until_ready(out_full)
    ref_full = _reference_dlinear(x, w_s, b_s, w_t, b_t, kernel_size, C)
    assert out_full.shape == ref_full.shape == (B, P, C)
    assert jnp.allclose(out_full, ref_full, atol=2e-3, rtol=2e-3)

    # individual, multi-target: (B, P, C)
    out_ind = dlinear_forward(x, w_si, b_si, w_ti, b_ti, kernel_size=kernel_size,
                              individual=True, n_targs=C)
    jax.block_until_ready(out_ind)
    ref_ind = _reference_dlinear(x, w_si, b_si, w_ti, b_ti, kernel_size, C, individual=True)
    assert out_ind.shape == ref_ind.shape == (B, P, C)
    assert jnp.allclose(out_ind, ref_ind, atol=2e-3, rtol=2e-3)

    # individual, n_targs == 1: (B, P)
    out_ind1 = dlinear_forward(x, w_si, b_si, w_ti, b_ti, kernel_size=kernel_size,
                               individual=True, n_targs=1)
    jax.block_until_ready(out_ind1)
    ref_ind1 = _reference_dlinear(x, w_si, b_si, w_ti, b_ti, kernel_size, 1, individual=True)
    assert out_ind1.shape == ref_ind1.shape == (B, P)
    assert jnp.allclose(out_ind1, ref_ind1, atol=2e-3, rtol=2e-3)

    print("KERNEL_OK")
</pallas_src>

<mosaic_0001>
module attributes {stable_mosaic.version = 11 : i64} {
  func.func @_dlinear_matmul_kernel(%arg0: i32, %arg1: memref<8x128xf32, #tpu.memory_space<vmem>>, %arg2: memref<128x64xf32, #tpu.memory_space<vmem>>, %arg3: memref<1x64xf32, #tpu.memory_space<vmem>>, %arg4: memref<8x64xf32, #tpu.memory_space<vmem>>) attributes {dimension_semantics = [#tpu.dimension_semantics<parallel>], iteration_bounds = array<i64: 1>, scalar_prefetch = 0 : i64, scratch_operands = 0 : i64, tpu.core_type = #tpu.core_type<tc>, window_params = [{transform_indices = @transform_0, window_bounds = array<i64: 8, 128>}, {pipeline_mode = #tpu.pipeline_mode<synchronous>, transform_indices = @transform_1, window_bounds = array<i64: 128, 64>}, {pipeline_mode = #tpu.pipeline_mode<synchronous>, transform_indices = @transform_2, window_bounds = array<i64: 1, 64>}, {transform_indices = @transform_3, window_bounds = array<i64: 8, 64>}]} {
    %c0 = arith.constant 0 : index
    %c0_0 = arith.constant 0 : index
    %0 = vector.load %arg1[%c0, %c0_0] : memref<8x128xf32, #tpu.memory_space<vmem>>, vector<8x128xf32>
    %c0_1 = arith.constant 0 : index
    %c0_2 = arith.constant 0 : index
    %1 = vector.load %arg2[%c0_1, %c0_2] : memref<128x64xf32, #tpu.memory_space<vmem>>, vector<128x64xf32>
    %cst = arith.constant dense<0.000000e+00> : vector<8x64xf32>
    %2 = tpu.matmul %0, %1, %cst {dimension_numbers = #tpu.dot_dimension_numbers<[1], [0], [0], [1], [0, 0, 1, 1], [], []>} : vector<8x128xf32>, vector<128x64xf32>, vector<8x64xf32> -> vector<8x64xf32>
    %c0_3 = arith.constant 0 : index
    %c0_4 = arith.constant 0 : index
    %3 = vector.load %arg3[%c0_3, %c0_4] : memref<1x64xf32, #tpu.memory_space<vmem>>, vector<1x64xf32>
    %4 = vector.broadcast %3 : vector<1x64xf32> to vector<8x64xf32>
    %5 = arith.addf %2, %4 : vector<8x64xf32>
    %c0_5 = arith.constant 0 : index
    %c0_6 = arith.constant 0 : index
    %6 = vector.load %arg4[%c0_5, %c0_6] : memref<8x64xf32, #tpu.memory_space<vmem>>, vector<8x64xf32>
    tpu.vector_store %arg4[%c0_5, %c0_6], %5 {strides = array<i32>} : memref<8x64xf32, #tpu.memory_space<vmem>>, vector<8x64xf32>,
    return
  }
  func.func @transform_0(%arg0: i32) -> (i32, i32) {
    %c0_i32 = arith.constant 0 : i32
    %c0_i32_0 = arith.constant 0 : i32
    return %arg0, %c0_i32 : i32, i32
  }
  func.func @transform_1(%arg0: i32) -> (i32, i32) {
    %c0_i32 = arith.constant 0 : i32
    %c0_i32_0 = arith.constant 0 : i32
    %c0_i32_1 = arith.constant 0 : i32
    return %c0_i32, %c0_i32_0 : i32, i32
  }
  func.func @transform_2(%arg0: i32) -> (i32, i32) {
    %c0_i32 = arith.constant 0 : i32
    %c0_i32_0 = arith.constant 0 : i32
    %c0_i32_1 = arith.constant 0 : i32
    return %c0_i32, %c0_i32_0 : i32, i32
  }
  func.func @transform_3(%arg0: i32) -> (i32, i32) {
    %c0_i32 = arith.constant 0 : i32
    %c0_i32_0 = arith.constant 0 : i32
    return %arg0, %c0_i32 : i32, i32
  }
}

</mosaic_0001>

<bundles_post_ra>
// kernel: tpu_custom_call.1
= control target key start
LH: loop header
LB: loop body
LE: loop exit
PB: predicated region body
PF: predicated region fallthrough
CT: control target
= control target key end

     0   :  { %v230_v3 = vmov 0.0|0.0   ;;  %vm231_vm0 = vmmov 0   ;;  %v232_v6 = vmov 0.0   ;;  %s320_s0 = inlined_call_operand.vmem [shape: f32[8,128], index: 0, kind: input, shape index: {}]   ;;  %s321_s1 = inlined_call_operand.vmem [shape: f32[128,64], index: 1, kind: input, shape index: {}]   ;;  %s322_s2 = inlined_call_operand.vmem [shape: f32[1,64], index: 2, kind: input, shape index: {}]   ;;  %s323_s3 = inlined_call_operand.hbm [shape: f32[8,64], index: 3, kind: output, shape index: {}]  }
   0x1   :  { %v16_v0 = vld [vmem:[%s321_s1] sm:$0xff]  ;;  %v17_v1 = vld [vmem:[%s321_s1 + $0x8] sm:$0xff]  ;;  %v18_v2 = vld [vmem:[%s321_s1 + $0x10] sm:$0xff]  ;;  %178 = vmatprep.subr.bf16.mxu0 %v230_v3  ;;  %175 = vmatprep.mubr.msk.f32.mxu0 %vm231_vm0, %v232_v6 }
   0x2   :  { %v179_v4 = vpack.c.bf16 %v17_v1, %v16_v0  ;;  %v19_v5 = vld [vmem:[%s321_s1 + $0x18] sm:$0xff]  ;;  %v20_v8 = vld [vmem:[%s321_s1 + $0x20] sm:$0xff]  ;;  %v21_v9 = vld [vmem:[%s321_s1 + $0x28] sm:$0xff] }
   0x3   :  { %v182_v7 = vpack.c.bf16 %v19_v5, %v18_v2 }
   0x4   :  { %180 = vmatpush3.bf16.msra.mxu0 %v179_v4 }
   0x5   :  { %181 = vmatprep.subr.bf16.mxu0 %v230_v3 }
   0x6   :  { %8 = vsyncpa [#allocation3], 0  ;;  %v185_v10 = vpack.c.bf16 %v21_v9, %v20_v8  ;;  %v22_v11 = vld [vmem:[%s321_s1 + $0x30] sm:$0xff]  ;;  %v23_v12 = vld [vmem:[%s321_s1 + $0x38] sm:$0xff]  ;;  %s233_s21 = smov [#allocation2]   ;;  %vm109_vm1 = vcmask 523264  }
   0x7   :  { %v188_v13 = vpack.c.bf16 %v23_v12, %v22_v11  ;;  %v24_v14 = vld [vmem:[%s321_s1 + $0x40] sm:$0xff]  ;;  %v25_v15 = vld [vmem:[%s321_s1 + $0x48] sm:$0xff]  ;;  %v26_v17 = vld [vmem:[%s321_s1 + $0x50] sm:$0xff]  ;;  %s117_s22 = sshll.u32 %s233_s21, 4  ;;  %s118_s22 = int_to_ptr.vmem [resolvable:$true] %s117_s22 }
   0x8   :  { %183 = vmatpush3.bf16.msra.mxu0 %v182_v7  ;;  %v191_v16 = vpack.c.bf16 %v25_v15, %v24_v14  ;;  %v27_v18 = vld [vmem:[%s321_s1 + $0x58] sm:$0xff]  ;;  %v28_v20 = vld [vmem:[%s321_s1 + $0x60] sm:$0xff]  ;;  %v29_v21 = vld [vmem:[%s321_s1 + $0x68] sm:$0xff]  ;;  %p211_p1 = scmp.lt.s32.totalorder %s118_s22, %s118_s22 }
   0x9   :  { %184 = vmatprep.subr.bf16.mxu0 %v230_v3  ;;  %v194_v19 = vpack.c.bf16 %v27_v18, %v26_v17  ;;  %v197_v22 = vpack.c.bf16 %v29_v21, %v28_v20  ;;  %v30_v23 = vld [vmem:[%s321_s1 + $0x70] sm:$0xff]  ;;  %v31_v24 = vld [vmem:[%s321_s1 + $0x78] sm:$0xff]  ;;  %v15_v26 = vld [vmem:[%s320_s0] sm:$0xff]  ;;  %s206_s1 = scalar_lea.vmem %s118_s22, 128 }
   0xa   :  { %v200_v25 = vpack.c.bf16 %v31_v24, %v30_v23  ;;  %v125_v27 = vld [vmem:[%s322_s2] ss:$0 sm:$0xff]  ;;  %p207_p0 = scmp.ne.s32.totalorder %s118_s22, %s206_s1  ;;  %p212_p2 = scmp.lt.s32.totalorder %s206_s1, %s206_s1 }
   0xc   :  { %186 = vmatpush3.bf16.msra.mxu0 %v185_v10  ;;  %p213_p3 = por %p212_p2, %p211_p1 }
   0xd   :  { %187 = vmatprep.subr.bf16.mxu0 %v230_v3 }
   0xe   :  { %p214_p4 = pnand %p213_p3, %p207_p0 }
  0x10   :  { %189 = vmatpush3.bf16.msra.mxu0 %v188_v13 }
  0x11   :  { %190 = vmatprep.subr.bf16.mxu0 %v230_v3 }
  0x14   :  { %192 = vmatpush3.bf16.msra.mxu0 %v191_v16 }
  0x15   :  { %193 = vmatprep.subr.bf16.mxu0 %v230_v3 }
  0x18   :  { %195 = vmatpush3.bf16.msra.mxu0 %v194_v19 }
  0x19   :  { %196 = vmatprep.subr.bf16.mxu0 %v230_v3 }
  0x1c   :  { %198 = vmatpush3.bf16.msra.mxu0 %v197_v22 }
  0x1d   :  { %199 = vmatprep.subr.bf16.mxu0 %v230_v3 }
  0x20   :  { %201 = vmatpush3.bf16.msra.mxu0 %v200_v25 }
  0x23   :  { %176 = vmatmul.mubr.f32.vlgmr.msra.gmra.mrb[0].mxu0 %v15_v26 }
  0xf6   :  { %v105_v28 = vpop.f32.mrb[0].mxu0 }
  0xf7   :  { %v106_v29 = vadd.f32 %v125_v27, %v105_v28  ;;  %v177_v30 = vpop.f32.mrb[1].mxu0 }
  0xf9   :  { %110 = vst.msk [vmem:[#allocation2] sm:$0xff] %vm109_vm1, %v106_v29 }
  0xfa   :  { %217 = shalt.err (!%p214_p4)
}
  0xfb   :  { %s218_s24 = scalar_lea.hbm %s323_s3, 128 }
  0xfc   :  { %p219_p5 = scmp.ne.s32.totalorder %s323_s3, %s218_s24  ;;  %p222_p6 = scmp.lt.u32.totalorder %s218_s24, %s323_s3 }
  0xfe   :  { %p224_p7 = pnand %p222_p6, %p219_p5 }
 0x100   :  { %227 = shalt.err (!%p224_p7)
}
 0x101   :  { %120 = dma.vmem_to_hbm [thread:$0]  %s118_s22, 128, %s323_s3, [#allocation3]  }
 0x102   :  { %228 = dma.done.wait [#allocation3], 128  }
 0x103   :  { %229 = vsyncadd [#allocation3], 4294967168 }
 0x104   :  { %124 = vsyncpa [#allocation3], 1 }

</bundles_post_ra>
